<compile_context>
chip_gen: v5e
topology: v5e:2x2
jax: 0.10.0
libtpu: 0.0.40
codegen_flags: <defaults>
</compile_context>

<pallas_src>
import jax
import jax.numpy as jnp
from jax.experimental import pallas as pl
from jax.experimental.pallas import tpu as pltpu


def _acb_kernel(x_ref, w_ref, shift_ref, wa1t_ref, ba1_ref, wa2_ref, ba2_ref,
                o_ref):
    # x_ref: (NB, Cin, HW)   o_ref: (NB, Cout, HW)   -- HW on the lane axis.
    w = w_ref[...]                        # (Cout, Cin), BN scale folded in
    shift = shift_ref[...]                # (Cout, 1), bias + BN shift folded
    wa1t = wa1t_ref[...]                  # (Cout, Cr)
    ba1 = ba1_ref[...]                    # (1, Cr)
    wa2 = wa2_ref[...]                    # (Cout, Cr)
    ba2 = ba2_ref[...]                    # (Cout, 1)

    nb = x_ref.shape[0]
    cin = w.shape[1]

    # Static unroll over the batch sub-block (NB is small and static).
    for b in range(nb):
        x = x_ref[b]                      # (Cin, HW)

        # 1x1 conv + folded BN + ReLU as Cin unrolled VPU FMAs (no MXU).
        acc = w[:, 0:1] * x[0:1, :]       # (Cout,1)*(1,HW) -> (Cout,HW)
        for c in range(1, cin):
            acc = acc + w[:, c:c + 1] * x[c:c + 1, :]
        y = jnp.maximum(acc + shift, 0.0)                            # (Cout, HW)

        # SE attention: global avg pool -> fc -> ReLU -> fc -> sigmoid, all
        # VPU broadcast-multiplies + XLU reductions (tiny matvecs, no MXU).
        pooled = jnp.mean(y, axis=1, keepdims=True)                  # (Cout, 1)
        h = jnp.sum(wa1t * pooled, axis=0, keepdims=True)            # (1, Cr)
        h = jnp.maximum(h + ba1, 0.0)
        att = jnp.sum(wa2 * h, axis=1, keepdims=True)                # (Cout, 1)
        att = jax.nn.sigmoid(att + ba2)

        # Lane-dense store: last dim is HW.
        o_ref[b] = y * att


def _pick_batch_block(n, bytes_per_image, target_bytes=1 << 20, max_nb=8):
    """Largest divisor of n (<= max_nb) whose block fits target_bytes, while
    keeping at least two grid steps when n >= 2 (so megacore can split)."""
    nb = 1
    for cand in range(1, min(n, max_nb) + 1):
        if n % cand == 0 and cand * bytes_per_image <= target_bytes:
            nb = cand
    while nb > 1 and (n // nb) < 2:
        nb -= 1
        while nb > 1 and n % nb != 0:
            nb -= 1
    return nb


def acb_block(x_nchw, params, eps=1e-5):
    """x_nchw: (N, Cin, H, W) float32.  Returns (N, Cout, H, W)."""
    (w1, b1, gamma, beta, running_mean, running_var,
     wa1, ba1, wa2, ba2) = params
    N, Cin, H, W = x_nchw.shape
    Cout = w1.shape[0]
    Cr = wa1.shape[0]
    HW = H * W

    # ---- host-side folding of BN (eval form) + conv bias ----
    bn_scale = gamma / jnp.sqrt(running_var + eps)                       # (Cout,)
    w_f = w1 * bn_scale[:, None]                                         # (Cout, Cin)
    shift = (b1 * bn_scale + beta - running_mean * bn_scale)[:, None]    # (Cout, 1)

    # Attention weights oriented so the kernel needs no transposes.
    wa1_t = wa1.T                                                        # (Cout, Cr)
    ba1_row = ba1.reshape(1, Cr)
    ba2_col = ba2.reshape(Cout, 1)

    # NCHW -> (N, Cin, HW): free reshape, no transpose.
    x = x_nchw.reshape(N, Cin, HW)

    # Batch sub-block size: amortise per-grid-step overhead for large N.
    bytes_per_image = 4 * HW * (Cin + Cout)
    NB = _pick_batch_block(N, bytes_per_image)
    grid_n = N // NB

    # Explicit VMEM budget: double-buffered x/out blocks + resident weights.
    block_bytes = NB * bytes_per_image
    weight_bytes = 4 * (Cout * Cin + Cout + 2 * Cout * Cr + Cr + Cout)
    vmem_limit = int(min(64 * 2**20,
                         max(4 * 2**20, 4 * block_bytes + 4 * weight_bytes)))

    out = pl.pallas_call(
        _acb_kernel,
        out_shape=jax.ShapeDtypeStruct((N, Cout, HW), jnp.float32),
        grid_spec=pltpu.PrefetchScalarGridSpec(
            num_scalar_prefetch=0,
            grid=(grid_n,),
            in_specs=[
                pl.BlockSpec((NB, Cin, HW), lambda n: (n, 0, 0)),     # x
                pl.BlockSpec((Cout, Cin), lambda n: (0, 0)),          # folded conv w
                pl.BlockSpec((Cout, 1), lambda n: (0, 0)),            # folded shift
                pl.BlockSpec((Cout, Cr), lambda n: (0, 0)),           # wa1^T
                pl.BlockSpec((1, Cr), lambda n: (0, 0)),              # ba1
                pl.BlockSpec((Cout, Cr), lambda n: (0, 0)),           # wa2
                pl.BlockSpec((Cout, 1), lambda n: (0, 0)),            # ba2
            ],
            out_specs=pl.BlockSpec((NB, Cout, HW), lambda n: (n, 0, 0)),
        ),
        compiler_params=pltpu.CompilerParams(
            dimension_semantics=("parallel",),
            vmem_limit_bytes=vmem_limit),
    )(x, w_f, shift, wa1_t, ba1_row, wa2, ba2_col)

    # (N, Cout, HW) -> NCHW: free reshape.
    return out.reshape(N, Cout, H, W)


def _reference(x_nchw, params, eps=1e-5):
    """Pure-JAX reference replicating the PyTorch ACBBlock (eval-mode BN)."""
    (w1, b1, gamma, beta, running_mean, running_var,
     wa1, ba1, wa2, ba2) = params
    y = jnp.einsum('nchw,oc->nohw', x_nchw, w1) + b1[None, :, None, None]
    y = (gamma[None, :, None, None]
         * (y - running_mean[None, :, None, None])
         / jnp.sqrt(running_var[None, :, None, None] + eps)
         + beta[None, :, None, None])
    y = jnp.maximum(y, 0.0)
    pooled = jnp.mean(y, axis=(2, 3))                     # (N, Cout)
    h = jnp.maximum(pooled @ wa1.T + ba1, 0.0)            # (N, Cr)
    att = jax.nn.sigmoid(h @ wa2.T + ba2)                 # (N, Cout)
    return y * att[:, :, None, None]


def make_params(key, in_channels, out_channels, reduction_ratio=3):
    cr = out_channels // reduction_ratio
    ks = jax.random.split(key, 8)
    # PyTorch-layout weights: Conv2d 1x1 weight is (Cout, Cin).
    w1 = jax.random.normal(ks[0], (out_channels, in_channels), jnp.float32) * 0.2
    b1 = jax.random.normal(ks[1], (out_channels,), jnp.float32) * 0.1
    gamma = 1.0 + 0.1 * jax.random.normal(ks[2], (out_channels,), jnp.float32)
    beta = 0.1 * jax.random.normal(ks[3], (out_channels,), jnp.float32)
    running_mean = 0.05 * jax.random.normal(ks[4], (out_channels,), jnp.float32)
    running_var = jnp.abs(jax.random.normal(ks[5], (out_channels,), jnp.float32)) + 1.0
    wa1 = jax.random.normal(ks[6], (cr, out_channels), jnp.float32) * 0.3
    ba1 = jnp.zeros((cr,), jnp.float32)
    wa2 = jax.random.normal(ks[7], (out_channels, cr), jnp.float32) * 0.3
    ba2 = jnp.zeros((out_channels,), jnp.float32)
    return (w1, b1, gamma, beta, running_mean, running_var, wa1, ba1, wa2, ba2)


if __name__ == "__main__":
    key = jax.random.PRNGKey(0)
    kx, kp = jax.random.split(key)

    N, Cin, H, W = 2, 4, 16, 16
    Cout, RED = 6, 3

    x = jax.random.normal(kx, (N, Cin, H, W), jnp.float32)
    params = make_params(kp, Cin, Cout, RED)

    out = jax.block_until_ready(acb_block(x, params))
    ref = _reference(x, params)

    assert out.shape == (N, Cout, H, W)
    assert jnp.max(jnp.abs(out - ref)) < 2e-4

    print("KERNEL_OK")
</pallas_src>

<mosaic_0001>
module attributes {stable_mosaic.version = 11 : i64} {
  func.func @_acb_kernel(%arg0: i32, %arg1: memref<1x4x256xf32, #tpu.memory_space<vmem>>, %arg2: memref<6x4xf32, #tpu.memory_space<vmem>>, %arg3: memref<6x1xf32, #tpu.memory_space<vmem>>, %arg4: memref<6x2xf32, #tpu.memory_space<vmem>>, %arg5: memref<1x2xf32, #tpu.memory_space<vmem>>, %arg6: memref<6x2xf32, #tpu.memory_space<vmem>>, %arg7: memref<6x1xf32, #tpu.memory_space<vmem>>, %arg8: memref<1x6x256xf32, #tpu.memory_space<vmem>>) attributes {dimension_semantics = [#tpu.dimension_semantics<parallel>], iteration_bounds = array<i64: 2>, scalar_prefetch = 0 : i64, scratch_operands = 0 : i64, tpu.core_type = #tpu.core_type<tc>, window_params = [{transform_indices = @transform_0, window_bounds = array<i64: 1, 4, 256>}, {pipeline_mode = #tpu.pipeline_mode<synchronous>, transform_indices = @transform_1, window_bounds = array<i64: 6, 4>}, {pipeline_mode = #tpu.pipeline_mode<synchronous>, transform_indices = @transform_2, window_bounds = array<i64: 6, 1>}, {pipeline_mode = #tpu.pipeline_mode<synchronous>, transform_indices = @transform_3, window_bounds = array<i64: 6, 2>}, {pipeline_mode = #tpu.pipeline_mode<synchronous>, transform_indices = @transform_4, window_bounds = array<i64: 1, 2>}, {pipeline_mode = #tpu.pipeline_mode<synchronous>, transform_indices = @transform_5, window_bounds = array<i64: 6, 2>}, {pipeline_mode = #tpu.pipeline_mode<synchronous>, transform_indices = @transform_6, window_bounds = array<i64: 6, 1>}, {transform_indices = @transform_7, window_bounds = array<i64: 1, 6, 256>}]} {
    %c0 = arith.constant 0 : index
    %c0_0 = arith.constant 0 : index
    %0 = vector.load %arg2[%c0, %c0_0] : memref<6x4xf32, #tpu.memory_space<vmem>>, vector<6x4xf32>
    %c0_1 = arith.constant 0 : index
    %c0_2 = arith.constant 0 : index
    %1 = vector.load %arg3[%c0_1, %c0_2] : memref<6x1xf32, #tpu.memory_space<vmem>>, vector<6x1xf32>
    %c0_3 = arith.constant 0 : index
    %c0_4 = arith.constant 0 : index
    %2 = vector.load %arg4[%c0_3, %c0_4] : memref<6x2xf32, #tpu.memory_space<vmem>>, vector<6x2xf32>
    %c0_5 = arith.constant 0 : index
    %c0_6 = arith.constant 0 : index
    %3 = vector.load %arg5[%c0_5, %c0_6] : memref<1x2xf32, #tpu.memory_space<vmem>>, vector<1x2xf32>
    %c0_7 = arith.constant 0 : index
    %c0_8 = arith.constant 0 : index
    %4 = vector.load %arg6[%c0_7, %c0_8] : memref<6x2xf32, #tpu.memory_space<vmem>>, vector<6x2xf32>
    %c0_9 = arith.constant 0 : index
    %c0_10 = arith.constant 0 : index
    %5 = vector.load %arg7[%c0_9, %c0_10] : memref<6x1xf32, #tpu.memory_space<vmem>>, vector<6x1xf32>
    %c0_11 = arith.constant 0 : index
    %c0_12 = arith.constant 0 : index
    %c0_13 = arith.constant 0 : index
    %6 = vector.load %arg1[%c0_11, %c0_12, %c0_13] : memref<1x4x256xf32, #tpu.memory_space<vmem>>, vector<1x4x256xf32>
    %7 = vector.shape_cast %6 : vector<1x4x256xf32> to vector<4x256xf32>
    %8 = vector.extract_strided_slice %0 {offsets = [0, 0], sizes = [6, 1], strides = [1, 1]} : vector<6x4xf32> to vector<6x1xf32>
    %9 = vector.extract_strided_slice %7 {offsets = [0, 0], sizes = [1, 256], strides = [1, 1]} : vector<4x256xf32> to vector<1x256xf32>
    %10 = vector.broadcast %8 : vector<6x1xf32> to vector<6x256xf32>
    %11 = vector.broadcast %9 : vector<1x256xf32> to vector<6x256xf32>
    %12 = arith.mulf %10, %11 : vector<6x256xf32>
    %13 = vector.extract_strided_slice %0 {offsets = [0, 1], sizes = [6, 1], strides = [1, 1]} : vector<6x4xf32> to vector<6x1xf32>
    %14 = vector.extract_strided_slice %7 {offsets = [1, 0], sizes = [1, 256], strides = [1, 1]} : vector<4x256xf32> to vector<1x256xf32>
    %15 = vector.broadcast %13 : vector<6x1xf32> to vector<6x256xf32>
    %16 = vector.broadcast %14 : vector<1x256xf32> to vector<6x256xf32>
    %17 = arith.mulf %15, %16 : vector<6x256xf32>
    %18 = arith.addf %12, %17 : vector<6x256xf32>
    %19 = vector.extract_strided_slice %0 {offsets = [0, 2], sizes = [6, 1], strides = [1, 1]} : vector<6x4xf32> to vector<6x1xf32>
    %20 = vector.extract_strided_slice %7 {offsets = [2, 0], sizes = [1, 256], strides = [1, 1]} : vector<4x256xf32> to vector<1x256xf32>
    %21 = vector.broadcast %19 : vector<6x1xf32> to vector<6x256xf32>
    %22 = vector.broadcast %20 : vector<1x256xf32> to vector<6x256xf32>
    %23 = arith.mulf %21, %22 : vector<6x256xf32>
    %24 = arith.addf %18, %23 : vector<6x256xf32>
    %25 = vector.extract_strided_slice %0 {offsets = [0, 3], sizes = [6, 1], strides = [1, 1]} : vector<6x4xf32> to vector<6x1xf32>
    %26 = vector.extract_strided_slice %7 {offsets = [3, 0], sizes = [1, 256], strides = [1, 1]} : vector<4x256xf32> to vector<1x256xf32>
    %27 = vector.broadcast %25 : vector<6x1xf32> to vector<6x256xf32>
    %28 = vector.broadcast %26 : vector<1x256xf32> to vector<6x256xf32>
    %29 = arith.mulf %27, %28 : vector<6x256xf32>
    %30 = arith.addf %24, %29 : vector<6x256xf32>
    %31 = vector.broadcast %1 : vector<6x1xf32> to vector<6x256xf32>
    %32 = arith.addf %30, %31 : vector<6x256xf32>
    %cst = arith.constant 0.000000e+00 : f32
    %33 = vector.broadcast %cst : f32 to vector<6x256xf32>
    %34 = arith.maximumf %32, %33 : vector<6x256xf32>
    %cst_14 = arith.constant dense<0.000000e+00> : vector<6xf32>
    %35 = vector.multi_reduction <add>, %34, %cst_14 [1] : vector<6x256xf32> to vector<6xf32>
    %36 = vector.shape_cast %35 : vector<6xf32> to vector<6x1xf32>
    %cst_15 = arith.constant 2.560000e+02 : f32
    %37 = vector.broadcast %cst_15 : f32 to vector<6x1xf32>
    %38 = arith.divf %36, %37 : vector<6x1xf32>
    %39 = vector.broadcast %38 : vector<6x1xf32> to vector<6x2xf32>
    %40 = arith.mulf %2, %39 : vector<6x2xf32>
    %cst_16 = arith.constant dense<0.000000e+00> : vector<2xf32>
    %41 = vector.multi_reduction <add>, %40, %cst_16 [0] : vector<6x2xf32> to vector<2xf32>
    %42 = vector.shape_cast %41 : vector<2xf32> to vector<1x2xf32>
    %43 = arith.addf %42, %3 : vector<1x2xf32>
    %cst_17 = arith.constant 0.000000e+00 : f32
    %44 = vector.broadcast %cst_17 : f32 to vector<1x2xf32>
    %45 = arith.maximumf %43, %44 : vector<1x2xf32>
    %46 = vector.broadcast %45 : vector<1x2xf32> to vector<6x2xf32>
    %47 = arith.mulf %4, %46 : vector<6x2xf32>
    %cst_18 = arith.constant dense<0.000000e+00> : vector<6xf32>
    %48 = vector.multi_reduction <add>, %47, %cst_18 [1] : vector<6x2xf32> to vector<6xf32>
    %49 = vector.shape_cast %48 : vector<6xf32> to vector<6x1xf32>
    %50 = arith.addf %49, %5 : vector<6x1xf32>
    %51 = arith.negf %50 : vector<6x1xf32>
    %52 = math.exp %51 : vector<6x1xf32>
    %cst_19 = arith.constant 1.000000e+00 : f32
    %53 = vector.broadcast %cst_19 : f32 to vector<6x1xf32>
    %54 = arith.addf %53, %52 : vector<6x1xf32>
    %55 = arith.divf %53, %54 : vector<6x1xf32>
    %56 = vector.broadcast %55 : vector<6x1xf32> to vector<6x256xf32>
    %57 = arith.mulf %34, %56 : vector<6x256xf32>
    %c0_20 = arith.constant 0 : index
    %c0_21 = arith.constant 0 : index
    %c0_22 = arith.constant 0 : index
    %58 = vector.load %arg8[%c0_20, %c0_21, %c0_22] : memref<1x6x256xf32, #tpu.memory_space<vmem>>, vector<1x6x256xf32>
    %59 = vector.shape_cast %58 : vector<1x6x256xf32> to vector<6x256xf32>
    %60 = vector.shape_cast %57 : vector<6x256xf32> to vector<1x6x256xf32>
    tpu.vector_store %arg8[%c0_20, %c0_21, %c0_22], %60 {strides = array<i32>} : memref<1x6x256xf32, #tpu.memory_space<vmem>>, vector<1x6x256xf32>,
    return
  }
  func.func @transform_0(%arg0: i32) -> (i32, i32, i32) {
    %c0_i32 = arith.constant 0 : i32
    %c0_i32_0 = arith.constant 0 : i32
    %c0_i32_1 = arith.constant 0 : i32
    return %arg0, %c0_i32, %c0_i32_0 : i32, i32, i32
  }
  func.func @transform_1(%arg0: i32) -> (i32, i32) {
    %c0_i32 = arith.constant 0 : i32
    %c0_i32_0 = arith.constant 0 : i32
    %c0_i32_1 = arith.constant 0 : i32
    return %c0_i32, %c0_i32_0 : i32, i32
  }
  func.func @transform_2(%arg0: i32) -> (i32, i32) {
    %c0_i32 = arith.constant 0 : i32
    %c0_i32_0 = arith.constant 0 : i32
    %c0_i32_1 = arith.constant 0 : i32
    return %c0_i32, %c0_i32_0 : i32, i32
  }
  func.func @transform_3(%arg0: i32) -> (i32, i32) {
    %c0_i32 = arith.constant 0 : i32
    %c0_i32_0 = arith.constant 0 : i32
    %c0_i32_1 = arith.constant 0 : i32
    return %c0_i32, %c0_i32_0 : i32, i32
  }
  func.func @transform_4(%arg0: i32) -> (i32, i32) {
    %c0_i32 = arith.constant 0 : i32
    %c0_i32_0 = arith.constant 0 : i32
    %c0_i32_1 = arith.constant 0 : i32
    return %c0_i32, %c0_i32_0 : i32, i32
  }
  func.func @transform_5(%arg0: i32) -> (i32, i32) {
    %c0_i32 = arith.constant 0 : i32
    %c0_i32_0 = arith.constant 0 : i32
    %c0_i32_1 = arith.constant 0 : i32
    return %c0_i32, %c0_i32_0 : i32, i32
  }
  func.func @transform_6(%arg0: i32) -> (i32, i32) {
    %c0_i32 = arith.constant 0 : i32
    %c0_i32_0 = arith.constant 0 : i32
    %c0_i32_1 = arith.constant 0 : i32
    return %c0_i32, %c0_i32_0 : i32, i32
  }
  func.func @transform_7(%arg0: i32) -> (i32, i32, i32) {
    %c0_i32 = arith.constant 0 : i32
    %c0_i32_0 = arith.constant 0 : i32
    %c0_i32_1 = arith.constant 0 : i32
    return %arg0, %c0_i32, %c0_i32_0 : i32, i32, i32
  }
}

</mosaic_0001>

<bundles_post_ra>
// kernel: tpu_custom_call.1
= control target key start
LH: loop header
LB: loop body
LE: loop exit
PB: predicated region body
PF: predicated region fallthrough
CT: control target
= control target key end

     0   :  { %s557_s24 = smov 0   ;;  %s602_s0 = inlined_call_operand.vmem [shape: f32[2,4,256], index: 0, kind: input, shape index: {}]   ;;  %s603_s1 = inlined_call_operand.vmem [shape: f32[6,4], index: 1, kind: input, shape index: {}]   ;;  %s604_s2 = inlined_call_operand.vmem [shape: f32[6,1], index: 2, kind: input, shape index: {}]   ;;  %s605_s3 = inlined_call_operand.vmem [shape: f32[6,2], index: 3, kind: input, shape index: {}]   ;;  %s606_s4 = inlined_call_operand.vmem [shape: f32[1,2], index: 4, kind: input, shape index: {}]   ;;  %s607_s5 = inlined_call_operand.vmem [shape: f32[6,2], index: 5, kind: input, shape index: {}]   ;;  %s608_s6 = inlined_call_operand.vmem [shape: f32[6,1], index: 6, kind: input, shape index: {}]   ;;  %s609_s7 = inlined_call_operand.vmem [shape: f32[2,6,256], index: 7, kind: output, shape index: {}]  }
   0x1 LB: > { %s465_s25 = sadd.s32 4294967295, %s510_s24   ;;  %p469_p0 = scmp.ge.s32.totalorder %s510_s24, 1  ;;  %s510_s24 = sphi %s557_s24, %s17_s24  }
   0x2   : > { %p237_p1 = scmp.lt.s32.totalorder %s510_s24, 3 }
   0x4   : > { %p238_p2 = pnand %p469_p0, %p237_p1 }
   0x5   : > { %p269_p3 = scmp.lt.s32.totalorder (!%p238_p2), %s465_s25, 1 }
   0x6   : > { %241 = sbr.rel (%p238_p2) target bundleno = 559 (0x22f), region = 48 }
   0xb   : > { %v279_v0 = vld [vmem:[%s603_s1] sm:$0x3f]  ;;  %v512_v1 = vmov 0   ;;  %v513_v2 = vmov 2   ;;  %v514_v4 = vmov 1   ;;  %v515_v5 = vmov 3  }
   0xc   : > { %492 = vset.pattern.permute.xlu0 %v512_v1  ;;  %494 = vset.pattern.permute.xlu1 %v513_v2  ;;  %v280_v3 = vld [vmem:[%s604_s2] sm:$0x3f]  ;;  %s611_s25 = smov (!%p269_p3, %s465_s25), 1  ;;  %vm351_vm0 = vcmask 1045504   ;;  %v516_v49 = vmov 256.0   ;;  %vm366_vm2 = vcmask 13312  }
   0xd   : > { %288 = vperm.xlu0 %492, %v279_v0   ;;  %315 = vperm.xlu1 %494, %v279_v0   ;;  %s477_s30 = sshll.u32 %s611_s25, 3  ;;  %498 = vrcp.f32 %v516_v49  ;;  %v281_v56 = vld [vmem:[%s605_s3] sm:$0x3f]  ;;  %s478_s19 = sshll.u32 %s611_s25, 4 }
   0xe   : > { %496 = vset.pattern.permute.xlu2 %v512_v1  ;;  %s273_s10 = scalar_lea.vmem %s602_s0, %s477_s30  ;;  %v282_v2 = vld [vmem:[%s606_s4] sm:$0x1]  ;;  %s278_s22 = scalar_lea.vmem %s609_s7, %s478_s19 }
   0xf   : > { %344 = vperm.xlu2 %496, %v280_v3   ;;  %v285_v6 = vld [vmem:[%s273_s10] sm:$0xff] }
  0x10   : > { %v292_v9 = vperm.slane %v285_v6, 0  ;;  %v293_v10 = vperm.slane %v285_v6, 4  ;;  %v304_v11 = vperm.slane %v285_v6, 1  ;;  %v305_v12 = vperm.slane %v285_v6, 5 }
  0x11   : > { %v318_v13 = vperm.slane %v285_v6, 2  ;;  %v319_v14 = vperm.slane %v285_v6, 6  ;;  %v332_v15 = vperm.slane %v285_v6, 3  ;;  %v333_v16 = vperm.slane %v285_v6, 7  ;;  %v283_v6 = vld [vmem:[%s607_s5] sm:$0x3f] }
  0x12   : > { %v296_v17 = vperm.slane %v292_v9, 0  ;;  %v297_v18 = vperm.slane %v293_v10, 0  ;;  %v308_v19 = vperm.slane %v304_v11, 1  ;;  %v309_v20 = vperm.slane %v305_v12, 1  ;;  %v284_v10 = vld [vmem:[%s608_s6] sm:$0x3f] }
  0x13   : > { %v322_v21 = vperm.slane %v318_v13, 2  ;;  %v323_v22 = vperm.slane %v319_v14, 2  ;;  %v336_v23 = vperm.slane %v332_v15, 3  ;;  %v337_v24 = vperm.slane %v333_v16, 3  ;;  %v499_v50 = vpop.eup %498 }
  0x14   : > { %v358_v51 = vmul.f32 256.0, %v499_v50  ;;  %vm362_vm1 = vweird.f32 %v499_v50 }
  0x15   : > { %493 = vset.pattern.permute.xlu0 %v514_v4  ;;  %495 = vset.pattern.permute.xlu1 %v515_v5 }
  0x16   : > { %301 = vperm.xlu0 %493, %v279_v0   ;;  %329 = vperm.xlu1 %495, %v279_v0   ;;  %v359_v52 = vsub.f32 1.0, %v358_v51 }
  0x18   : > { %v360_v53 = vmul.f32 %v499_v50, %v359_v52 }
  0x1a   : > { %v361_v54 = vadd.f32 %v499_v50, %v360_v53 }
  0x1c   : > { %v363_v55 = vsel %vm362_vm1, %v499_v50, %v361_v54 }
  0x1e   : > { %497 = vset.pattern.permute.xlu0 %v512_v1 }
  0x69   : > { %v345_v39 = vpop.permute.xlu2 %344 }
  0x7f   : > { %v289_v7 = vpop.permute.xlu0 %288  ;;  %v316_v8 = vpop.permute.xlu1 %315 }
  0x80   : > { %v298_v27 = vmul.f32 %v296_v17, %v289_v7  ;;  %v299_v28 = vmul.f32 %v297_v18, %v289_v7  ;;  %v324_v31 = vmul.f32 %v322_v21, %v316_v8  ;;  %v325_v32 = vmul.f32 %v323_v22, %v316_v8 }
  0x88   : > { %v302_v25 = vpop.permute.xlu0 %301  ;;  %v330_v26 = vpop.permute.xlu1 %329 }
  0x89   : > { %v310_v29 = vmul.f32 %v308_v19, %v302_v25  ;;  %v311_v30 = vmul.f32 %v309_v20, %v302_v25  ;;  %v338_v35 = vmul.f32 %v336_v23, %v330_v26  ;;  %v339_v36 = vmul.f32 %v337_v24, %v330_v26 }
  0x8b   : > { %v312_v33 = vadd.f32 %v310_v29, %v298_v27  ;;  %v313_v34 = vadd.f32 %v311_v30, %v299_v28 }
  0x8d   : > { %v326_v37 = vadd.f32 %v324_v31, %v312_v33  ;;  %v327_v38 = vadd.f32 %v325_v32, %v313_v34 }
  0x8f   : > { %v340_v40 = vadd.f32 %v338_v35, %v326_v37  ;;  %v341_v41 = vadd.f32 %v339_v36, %v327_v38 }
  0x91   : > { %v577_v42 = vadd.f32 %v345_v39, %v340_v40  ;;  %v579_v43 = vadd.f32 %v345_v39, %v341_v41 }
  0x93   : > { %v349_v44 = vmax.f32 %v577_v42, 0.0  ;;  %v350_v45 = vmax.f32 %v579_v43, 0.0 }
  0x95   : > { %v352_v46 = vsel %vm351_vm0, %v349_v44, 0.0  ;;  %v353_v47 = vsel %vm351_vm0, %v350_v45, 0.0 }
  0x96   : > { %v354_v48 = vadd.f32 %v353_v47, %v352_v46 }
  0x98   : > { %355 = vadd.xlane.f32.xlu2 %v354_v48 }
 0x10b   : > { %v356_v57 = vpop.xlane.xlu2 %355 }
 0x10c   : > { %v364_v58 = vmul.f32 %v363_v55, %v356_v57 }
 0x10e   : > { %v365_v59 = vmul.f32 %v364_v58, %v281_v56 }
 0x110   : > { %v367_v60 = vsel %vm366_vm2, %v365_v59, 0.0 }
 0x111   : > { %v368_v61 = vrot.slane %v367_v60, 4 }
 0x113   : > { %v369_v62 = vadd.f32 %v368_v61, %v367_v60 }
 0x115   : > { %v370_v63 = vrot.slane %v369_v62, 2 }
 0x117   : > { %v371_v0 = vadd.f32 %v370_v63, %v369_v62 }
 0x119   : > { %v372_v1 = vrot.slane %v371_v0, 1 }
 0x11b   : > { %v373_v3 = vadd.f32 %v372_v1, %v371_v0 }
 0x11d   : > { %v374_v4 = vadd.f32 %v373_v3, %v282_v2 }
 0x11f   : > { %v375_v5 = vmax.f32 %v374_v4, 0.0 }
 0x121   : > { %v376_v7 = vperm.slane %v375_v5, 0 }
 0x123   : > { %v377_v8 = vmul.f32 %v376_v7, %v283_v6 }
 0x125   : > { %v378_v9 = vsel %vm366_vm2, %v377_v8, 0.0 }
 0x126   : > { %379 = vadd.xlane.f32.xlu1 %v378_v9 }
 0x199   : > { %v380_v11 = vpop.xlane.xlu1 %379 }
 0x19a   : > { %v381_v12 = vadd.f32 %v380_v11, %v284_v10 }
 0x19c   : > { %v474_v13 = vmul.f32 -1.442695, %v381_v12 }
 0x19e   : > { %500 = vpow2.f32 %v474_v13 }
 0x1a4   : > { %v501_v14 = vpop.eup %500 }
 0x1a5   : > { %v385_v15 = vadd.f32 1.0, %v501_v14 }
 0x1a7   : > { %502 = vrcp.f32 %v385_v15  ;;  %v397_v19 = vand.u32 2147483648, %v385_v15  ;;  %v395_v21 = vand.u32 2147483647, %v385_v15  ;;  %vm391_vm4 = vweird.f32 %v385_v15 }
 0x1a9   : > { %v398_v23 = vor.u32 1.1754944e-38, %v397_v19  ;;  %vm396_vm6 = vcmp.eq.f32.partialorder %v395_v21, 8.507059e+37 }
 0x1ad   : > { %v503_v16 = vpop.eup %502 }
 0x1ae   : > { %v387_v17 = vmul.f32 %v503_v16, %v385_v15  ;;  %vm392_vm3 = vweird.f32 %v503_v16 }
 0x1af   : > { %vm393_vm5 = vmor %vm391_vm4, %vm392_vm3 }
 0x1b0   : > { %v388_v18 = vsub.f32 1.0, %v387_v17 }
 0x1b2   : > { %v389_v20 = vmul.f32 %v503_v16, %v388_v18 }
 0x1b4   : > { %v390_v22 = vadd.f32 %v503_v16, %v389_v20 }
 0x1b6   : > { %v394_v24 = vsel %vm393_vm5, %v503_v16, %v390_v22 }
 0x1b7   : > { %v399_v25 = vsel %vm396_vm6, %v398_v23, %v394_v24 }
 0x1b8   : > { %403 = vperm.xlu0 %497, %v399_v25  }
 0x22a   : > { %v404_v26 = vpop.permute.xlu0 %403 }
 0x22b   : > { %v406_v27 = vmul.f32 %v404_v26, %v349_v44  ;;  %v407_v28 = vmul.f32 %v404_v26, %v350_v45 }
 0x22d   : > { %408 = vst [vmem:[%s278_s22] sm:$0x3f] %v406_v27 }
 0x22e   : > { %409 = vst [vmem:[%s278_s22 + $0x8] sm:$0x3f] %v407_v28 }
 0x22f PF: > { %s17_s24 = sadd.s32 1, %s510_s24  }
 0x230   : > { %p14_p4 = scmp.ge.s32.totalorder %s17_s24, 4  }
 0x232   :  { %16 = sbr.rel (!%p14_p4) target bundleno = 1 (0x1), region = 78 }

</bundles_post_ra>
